<compile_context>
chip_gen: v7x
topology: tpu7x:2x2x1
jax: 0.10.0
libtpu: 0.0.40
codegen_flags: <defaults>
</compile_context>

<pallas_src>
import functools

import jax
import jax.numpy as jnp
from jax.experimental import pallas as pl
from jax.experimental.pallas import tpu as pltpu


_MAX_TK = 1024
_MAX_TN = 1024


def _round_up(n: int, m: int) -> int:
    return ((n + m - 1) // m) * m


def _weight_tiles(d_in: int, d_out: int):
    tk = min(_round_up(d_in, 128), _MAX_TK)
    tn = min(_round_up(d_out, 128), _MAX_TN)
    return tk, tn


def _pick_tm(B: int, sublane: int) -> int:
    """Pick the batch tile minimizing zero-padding waste (cap-ish at 256)."""
    exact = _round_up(B, sublane)          # zero (or minimal) batch padding
    if exact <= 256:
        return exact
    pad128 = _round_up(B, 128) - B
    pad256 = _round_up(B, 256) - B
    best_fixed = 256 if pad256 <= pad128 else 128
    best_pad = min(pad128, pad256)
    # A modestly larger exact tile beats wasting MXU work / x DMA on zeros.
    if exact <= 512 and (exact - B) < best_pad:
        return exact
    return best_fixed


def prepare_dense_params(weight, bias, compute_dtype=jnp.bfloat16):
    """One-time parameter prep (do NOT call per forward).

    weight: (output_dim, input_dim) f32   -- PyTorch nn.Linear convention
    bias:   (output_dim,)           f32
    Returns (w_p, b_p): weight pre-transposed to (Din_p, Dout_p), padded to
    tile multiples and cast to the MXU compute dtype; bias padded, kept f32.
    """
    d_out, d_in = weight.shape
    tk, tn = _weight_tiles(d_in, d_out)
    K_p = _round_up(d_in, tk)
    N_p = _round_up(d_out, tn)
    w_p = jnp.pad(
        jnp.asarray(weight).T, ((0, K_p - d_in), (0, N_p - d_out))
    ).astype(compute_dtype)
    b_p = jnp.pad(jnp.asarray(bias, jnp.float32), (0, N_p - d_out)).reshape(1, N_p)
    return w_p, b_p


# ----------------------------- kernels ------------------------------------


def _dense_kernel_single_k(x_ref, w_ref, b_ref, o_ref):
    # Whole contraction in one MXU pass: no accumulator, no init/finalize.
    o_ref[...] = (
        jnp.dot(x_ref[...], w_ref[...], preferred_element_type=jnp.float32)
        + b_ref[...]
    ).astype(o_ref.dtype)


def _dense_kernel_multi_k(x_ref, w_ref, b_ref, o_ref):
    # Output block (f32) is resident across the k axis -> use it directly as
    # the accumulator; bias serves as the k==0 initializer (no finalize pass).
    k = pl.program_id(2)

    @pl.when(k == 0)
    def _init():
        o_ref[...] = jnp.broadcast_to(b_ref[...], o_ref.shape).astype(o_ref.dtype)

    o_ref[...] += jnp.dot(
        x_ref[...], w_ref[...], preferred_element_type=jnp.float32
    )


# ----------------------------- wrapper -------------------------------------


@functools.partial(jax.jit, static_argnames=("d_out", "compute_dtype"))
def dense_forward(x, w_p, b_p, *, d_out, compute_dtype=jnp.bfloat16):
    """Equivalent of Dense.forward: Linear(x)[..., None, None].

    x:   (B, input_dim) f32
    w_p: (K_p, N_p)     pre-transposed/padded weight from prepare_dense_params
    b_p: (1, N_p)       padded bias (f32)
    returns (B, d_out, 1, 1) f32
    """
    B, d_in = x.shape
    K_p, N_p = w_p.shape
    tk = min(K_p, _MAX_TK)
    tn = min(N_p, _MAX_TN)

    itemsize = jnp.dtype(compute_dtype).itemsize
    sublane = 16 if itemsize == 2 else 8   # bf16 packs 2 rows per sublane
    tm = _pick_tm(B, sublane)
    B_p = _round_up(B, tm)

    grid_i = B_p // tm
    grid_j = N_p // tn
    grid_k = K_p // tk

    # v7x has 2 TensorCores: if both parallel axes collapse to one block,
    # split the N axis (still a lane-dense multiple of 128) so megacore
    # sharding has >= 2 blocks of work.
    if grid_i * grid_j == 1 and tn % 256 == 0:
        tn //= 2
        grid_j = N_p // tn

    # Per-call x padding + cast (activation-sized, unavoidable); padded
    # rows/cols contribute zeros to the contraction and are sliced off below.
    x_p = jnp.pad(x.astype(compute_dtype), ((0, B_p - B), (0, K_p - d_in)))

    # VMEM budget from the actual tile requirement + headroom (v7x-safe).
    w_bufs = 3 if grid_k > 1 else 2
    vmem_need = (
        2 * tm * tk * itemsize       # x tiles (double-buffered)
        + w_bufs * tk * tn * itemsize  # weight tiles
        + 2 * tn * 4                 # bias tiles
        + 2 * tm * tn * 4            # f32 output tiles
    )
    vmem_limit = min(vmem_need + (4 << 20), 48 << 20)

    if grid_k == 1:
        grid = (grid_i, grid_j)
        in_specs = [
            pl.BlockSpec((tm, tk), lambda i, j: (i, 0)),
            pl.BlockSpec((tk, tn), lambda i, j: (0, j)),
            pl.BlockSpec((1, tn), lambda i, j: (0, j)),
        ]
        out_spec = pl.BlockSpec((tm, tn), lambda i, j: (i, j))
        kernel = _dense_kernel_single_k
        dim_sem = ("parallel", "parallel")
    else:
        grid = (grid_i, grid_j, grid_k)
        in_specs = [
            pl.BlockSpec((tm, tk), lambda i, j, k: (i, k)),
            # Weight stream is the critical path in the mem-bound regime:
            # triple-buffer it to hide DMA issue/complete jitter.
            pl.BlockSpec(
                (tk, tn), lambda i, j, k: (k, j), pipeline_mode=pl.Buffered(3)
            ),
            pl.BlockSpec((1, tn), lambda i, j, k: (0, j)),
        ]
        out_spec = pl.BlockSpec((tm, tn), lambda i, j, k: (i, j))
        kernel = _dense_kernel_multi_k
        dim_sem = ("parallel", "parallel", "arbitrary")

    y_p = pl.pallas_call(
        kernel,
        out_shape=jax.ShapeDtypeStruct((B_p, N_p), jnp.float32),
        grid_spec=pltpu.PrefetchScalarGridSpec(
            num_scalar_prefetch=0,
            grid=grid,
            in_specs=in_specs,
            out_specs=out_spec,
        ),
        compiler_params=pltpu.CompilerParams(
            dimension_semantics=dim_sem,
            vmem_limit_bytes=vmem_limit,
        ),
    )(x_p, w_p, b_p)

    # Strip padding, then PyTorch's trailing [..., None, None].
    y = y_p[:B, :d_out]
    return y[..., None, None]


# ------------------------------ test --------------------------------------


if __name__ == "__main__":
    key = jax.random.PRNGKey(0)

    def make_case(case_key, batch, d_in, d_out):
        kx, kw, kb = jax.random.split(case_key, 3)
        bound = 1.0 / (d_in ** 0.5)  # nn.Linear default uniform init
        weight = jax.random.uniform(
            kw, (d_out, d_in), minval=-bound, maxval=bound, dtype=jnp.float32
        )
        bias = jax.random.uniform(
            kb, (d_out,), minval=-bound, maxval=bound, dtype=jnp.float32
        )
        x = jax.random.normal(kx, (batch, d_in), dtype=jnp.float32)
        return x, weight, bias

    # Case 1: small shapes (single-k fast path).  Case 2: exercises the
    # multi-k accumulation path (d_in > 1024 -> two k steps).
    cases = [(2, 32, 64), (2, 2048, 128)]
    for batch, d_in, d_out in cases:
        key, sub = jax.random.split(key)
        x, weight, bias = make_case(sub, batch, d_in, d_out)

        # One-time parameter prep (hoisted out of the per-call path).
        w_p, b_p = prepare_dense_params(weight, bias)

        out = dense_forward(x, w_p, b_p, d_out=d_out)
        out = jax.block_until_ready(out)
        assert out.shape == (batch, d_out, 1, 1), out.shape

        # Reference with matching bf16 operand rounding (MXU default behaviour).
        xq = x.astype(jnp.bfloat16).astype(jnp.float32)
        wq = weight.astype(jnp.bfloat16).astype(jnp.float32)
        ref_q = (xq @ wq.T + bias)[..., None, None]
        assert jnp.allclose(out, ref_q, atol=2e-4, rtol=2e-4), (
            "mismatch vs bf16-matched reference",
            float(jnp.max(jnp.abs(out - ref_q))),
        )

        # Loose check against the true-f32 reference (bf16 operand rounding).
        ref = (x @ weight.T + bias)[..., None, None]
        assert jnp.allclose(out, ref, atol=5e-2, rtol=5e-2), (
            "mismatch vs f32 reference",
            float(jnp.max(jnp.abs(out - ref))),
        )

    print("KERNEL_OK")
</pallas_src>

<mosaic_0001>
module attributes {stable_mosaic.version = 11 : i64} {
  func.func @_dense_kernel_single_k(%arg0: i32, %arg1: i32, %arg2: memref<16x128xbf16, #tpu.memory_space<vmem>>, %arg3: memref<128x128xbf16, #tpu.memory_space<vmem>>, %arg4: memref<1x128xf32, #tpu.memory_space<vmem>>, %arg5: memref<16x128xf32, #tpu.memory_space<vmem>>) attributes {dimension_semantics = [#tpu.dimension_semantics<parallel>, #tpu.dimension_semantics<parallel>], iteration_bounds = array<i64: 1, 1>, scalar_prefetch = 0 : i64, scratch_operands = 0 : i64, tpu.core_type = #tpu.core_type<tc>, window_params = [{transform_indices = @transform_0, window_bounds = array<i64: 16, 128>}, {transform_indices = @transform_1, window_bounds = array<i64: 128, 128>}, {transform_indices = @transform_2, window_bounds = array<i64: 1, 128>}, {transform_indices = @transform_3, window_bounds = array<i64: 16, 128>}]} {
    %c0 = arith.constant 0 : index
    %c0_0 = arith.constant 0 : index
    %0 = vector.load %arg2[%c0, %c0_0] : memref<16x128xbf16, #tpu.memory_space<vmem>>, vector<16x128xbf16>
    %c0_1 = arith.constant 0 : index
    %c0_2 = arith.constant 0 : index
    %1 = vector.load %arg3[%c0_1, %c0_2] : memref<128x128xbf16, #tpu.memory_space<vmem>>, vector<128x128xbf16>
    %cst = arith.constant dense<0.000000e+00> : vector<16x128xf32>
    %2 = tpu.matmul %0, %1, %cst {dimension_numbers = #tpu.dot_dimension_numbers<[1], [0], [0], [1], [0, 0, 1, 1], [], []>} : vector<16x128xbf16>, vector<128x128xbf16>, vector<16x128xf32> -> vector<16x128xf32>
    %c0_3 = arith.constant 0 : index
    %c0_4 = arith.constant 0 : index
    %3 = vector.load %arg4[%c0_3, %c0_4] : memref<1x128xf32, #tpu.memory_space<vmem>>, vector<1x128xf32>
    %4 = vector.broadcast %3 : vector<1x128xf32> to vector<16x128xf32>
    %5 = arith.addf %2, %4 : vector<16x128xf32>
    %c0_5 = arith.constant 0 : index
    %c0_6 = arith.constant 0 : index
    %6 = vector.load %arg5[%c0_5, %c0_6] : memref<16x128xf32, #tpu.memory_space<vmem>>, vector<16x128xf32>
    tpu.vector_store %arg5[%c0_5, %c0_6], %5 {strides = array<i32>} : memref<16x128xf32, #tpu.memory_space<vmem>>, vector<16x128xf32>,
    return
  }
  func.func @transform_0(%arg0: i32, %arg1: i32) -> (i32, i32) {
    %c0_i32 = arith.constant 0 : i32
    %c0_i32_0 = arith.constant 0 : i32
    return %arg0, %c0_i32 : i32, i32
  }
  func.func @transform_1(%arg0: i32, %arg1: i32) -> (i32, i32) {
    %c0_i32 = arith.constant 0 : i32
    %c0_i32_0 = arith.constant 0 : i32
    return %c0_i32, %arg1 : i32, i32
  }
  func.func @transform_2(%arg0: i32, %arg1: i32) -> (i32, i32) {
    %c0_i32 = arith.constant 0 : i32
    %c0_i32_0 = arith.constant 0 : i32
    return %c0_i32, %arg1 : i32, i32
  }
  func.func @transform_3(%arg0: i32, %arg1: i32) -> (i32, i32) {
    %c0_i32 = arith.constant 0 : i32
    return %arg0, %arg1 : i32, i32
  }
}

</mosaic_0001>

<bundles_post_ra>
// kernel: dense_forward.1
= control target key start
LH: loop header
LB: loop body
LE: loop exit
PB: predicated region body
PF: predicated region fallthrough
CT: control target
= control target key end

     0   :  { %8 = vsyncpa [#allocation3], 0  ;;  %s233_s12 = smov [#allocation2]   ;;  %s282_s0 = inlined_call_operand.vmem [shape: bf16[16,128], index: 0, kind: input, shape index: {}]   ;;  %s283_s1 = inlined_call_operand.hbm [shape: bf16[128,128], index: 1, kind: input, shape index: {}]   ;;  %s284_s2 = inlined_call_operand.vmem [shape: f32[1,128], index: 2, kind: input, shape index: {}]   ;;  %s285_s3 = inlined_call_operand.vmem [shape: f32[16,128], index: 3, kind: output, shape index: {}]  }
   0x1   :  { %s16_s13 = sshll.u32 %s233_s12, 4  ;;  %s209_s16 = scalar_lea.hbm %s283_s1, 1024  ;;  %s17_s13 = int_to_ptr.vmem [resolvable:$true] %s16_s13 }
   0x2   :  { %p210_p0 = scmp.ne.s32.totalorder %s283_s1, %s209_s16  ;;  %p213_p1 = scmp.lt.u32.totalorder %s209_s16, %s283_s1 }
   0x4   :  { %p215_p2 = pnand %p213_p1, %p210_p0 }
   0x6   :  { %218 = shalt.err (!%p215_p2)
}
   0x7   :  { %s219_s21 = scalar_lea.vmem %s17_s13, 1024  ;;  %p224_p4 = scmp.lt.s32.totalorder %s17_s13, %s17_s13 }
   0x8   :  { %p220_p3 = scmp.ne.s32.totalorder %s17_s13, %s219_s21  ;;  %p225_p5 = scmp.lt.s32.totalorder %s219_s21, %s219_s21 }
   0xa   :  { %p226_p6 = por %p225_p5, %p224_p4 }
   0xc   :  { %p227_p7 = pnand %p226_p6, %p220_p3 }
   0xe   :  { %230 = shalt.err (!%p227_p7)
}
   0xf   :  { %s234_s22 = smov 64   ;;  %s235_s23 = smov 4  }
  0x10   :  { %22 = dma.hbm_to_vmem [thread:$0]  %s283_s1, 1024, %s17_s13, [#allocation3], %s234_s22, %s234_s22, %s235_s23  }
  0x11   :  { %231 = dma.done.wait [#allocation3], 1024  }
  0x12   :  { %232 = vsyncadd [#allocation3], 4294966272  ;;  %v236_v0 = vmov 0.0   ;;  %vm237_vm0 = vmmov 0   ;;  %v200_v1 = vld [vmem:[#allocation2] sm:$0xff]   ;;  %v201_v2 = vld [vmem:[#allocation2 + $0x8] sm:$0xff]  }
  0x13   :  { %175 = vmatprep.subr.bf16.mxu0 %v236_v0  ;;  %191 = vmatprep.mubr.msk.bf16.mxu0 %vm237_vm0, %v236_v0  ;;  %v202_v3 = vld [vmem:[#allocation2 + $0x10] sm:$0xff]   ;;  %v203_v4 = vld [vmem:[#allocation2 + $0x18] sm:$0xff]   ;;  %v204_v5 = vld [vmem:[#allocation2 + $0x20] sm:$0xff]  }
  0x14   :  { %176 = vmatpush3.bf16.msra.mxu0 %v200_v1  ;;  %v205_v6 = vld [vmem:[#allocation2 + $0x28] sm:$0xff]   ;;  %v206_v7 = vld [vmem:[#allocation2 + $0x30] sm:$0xff]   ;;  %v207_v8 = vld [vmem:[#allocation2 + $0x38] sm:$0xff]  }
  0x15   :  { %177 = vmatprep.subr.bf16.mxu0 %v236_v0  ;;  %v208_v9 = vld [vmem:[%s282_s0] sm:$0xff]  }
  0x16   :  { %v156_v10 = vld [vmem:[%s284_s2] ss:$0 sm:$0xff] }
  0x18   :  { %178 = vmatpush3.bf16.msra.mxu0 %v201_v2 }
  0x19   :  { %179 = vmatprep.subr.bf16.mxu0 %v236_v0 }
  0x1c   :  { %180 = vmatpush3.bf16.msra.mxu0 %v202_v3 }
  0x1d   :  { %181 = vmatprep.subr.bf16.mxu0 %v236_v0 }
  0x20   :  { %182 = vmatpush3.bf16.msra.mxu0 %v203_v4 }
  0x21   :  { %183 = vmatprep.subr.bf16.mxu0 %v236_v0 }
  0x24   :  { %184 = vmatpush3.bf16.msra.mxu0 %v204_v5 }
  0x25   :  { %185 = vmatprep.subr.bf16.mxu0 %v236_v0 }
  0x28   :  { %186 = vmatpush3.bf16.msra.mxu0 %v205_v6 }
  0x29   :  { %187 = vmatprep.subr.bf16.mxu0 %v236_v0 }
  0x2c   :  { %188 = vmatpush3.bf16.msra.mxu0 %v206_v7 }
  0x2d   :  { %189 = vmatprep.subr.bf16.mxu0 %v236_v0 }
  0x30   :  { %190 = vmatpush3.bf16.msra.mxu0 %v207_v8 }
  0x33   :  { %192 = vmatmul.mubr.bf16.vlgmr.msra.gmra.mrb[0].mxu0 %v208_v9 }
 0x106   :  { %v142_v11 = vpop.f32.mrb[0].mxu0 }
 0x107   :  { %v143_v12 = vadd.f32 %v156_v10, %v142_v11  ;;  %v193_v13 = vpop.f32.mrb[1].mxu0 }
 0x108   :  { %v145_v14 = vpop.f32.mrb[2].mxu0 }
 0x109   :  { %149 = vst [vmem:[%s285_s3] sm:$0xff] %v143_v12  ;;  %v146_v15 = vadd.f32 %v156_v10, %v145_v14  ;;  %v194_v16 = vpop.f32.mrb[3].mxu0 }
 0x10b   :  { %150 = vst [vmem:[%s285_s3 + $0x8] sm:$0xff] %v146_v15 }
 0x10c   :  { %155 = vsyncpa [#allocation3], 1 }

</bundles_post_ra>
